<compile_context>
chip_gen: v7x
topology: tpu7x:2x2x1
jax: 0.10.0
libtpu: 0.0.40
codegen_flags: <defaults>
</compile_context>

<pallas_src>
import functools

import jax
import jax.numpy as jnp
from jax import lax
from jax.experimental import pallas as pl
from jax.experimental.pallas import tpu as pltpu

_LANE = 128
_SUBLANE = 8


def _vmem_capacity_bytes():
    try:
        return int(pltpu.get_tpu_info().vmem_capacity_bytes)
    except Exception:
        return 64 * 1024 * 1024   # conservative fallback (v7x per-TensorCore VMEM)


def _cdiv(a, b):
    return -(-a // b)


def _pick_block_rows(rows, bytes_per_row, budget, min_tiles=4):
    """Largest multiple-of-8 row-tile that fits the VMEM budget while keeping
    at least `min_tiles` grid steps (dual-TC sharding + pipelining)."""
    if rows <= _SUBLANE:
        return rows
    cap_vmem = max(_SUBLANE, budget // max(1, bytes_per_row))
    cap_par = max(_SUBLANE, rows // min_tiles)
    br = min(rows, cap_vmem, cap_par)
    br = max(_SUBLANE, (br // _SUBLANE) * _SUBLANE)
    return br


def _in_spec(block_shape, index_map, extra_buffering):
    """Input BlockSpec; requests 3-deep pipelining when tiles are small."""
    if extra_buffering and hasattr(pl, "Buffered"):
        try:
            return pl.BlockSpec(block_shape, index_map, pipeline_mode=pl.Buffered(3))
        except TypeError:
            pass
    return pl.BlockSpec(block_shape, index_map)


def _apply_row_mask(loss, row_offset, rows, block_rows):
    """Zero contributions from rows beyond the logical row count (padded tile)."""
    if rows % block_rows != 0:
        row_ids = row_offset + lax.broadcasted_iota(jnp.int32, loss.shape, 0)
        loss = jnp.where(row_ids < rows, loss, 0.0)
    return loss


# --------------------------------------------------------------------------
# Kernel 1: full-N row tile (common case — the whole softmax row is resident).
# --------------------------------------------------------------------------
def _bhat_fulln_kernel(fs_ref, ft_ref, out_ref, *, eps, use_softmax, rows,
                       block_rows, low_precision_transcendentals):
    fs = fs_ref[...].astype(jnp.float32)   # (bR, N)
    ft = ft_ref[...].astype(jnp.float32)   # (bR, N)

    if use_softmax:
        # Numerically-stable softmax with the 1/Z normalization factored out
        # (softmax outputs are non-negative, so no abs needed):
        #   sqrt(p_s*p_t + eps) = sqrt(e_s*e_t + eps*Zs*Zt) * rsqrt(Zs*Zt)
        ds = fs - jnp.max(fs, axis=-1, keepdims=True)
        dt = ft - jnp.max(ft, axis=-1, keepdims=True)
        if low_precision_transcendentals:
            # v6e/v7x: halve EUP width on exp/sqrt; lane-axis sums stay f32.
            es16 = jnp.exp(ds.astype(jnp.bfloat16))
            et16 = jnp.exp(dt.astype(jnp.bfloat16))
            es = es16.astype(jnp.float32)
            et = et16.astype(jnp.float32)
            zs = jnp.sum(es, axis=-1, keepdims=True)
            zt = jnp.sum(et, axis=-1, keepdims=True)
            zprod = zs * zt
            rad = (es16 * et16).astype(jnp.float32) + eps * zprod
            s = jnp.sum(jnp.sqrt(rad.astype(jnp.bfloat16)).astype(jnp.float32),
                        axis=-1, keepdims=True)
        else:
            es = jnp.exp(ds)
            et = jnp.exp(dt)
            zs = jnp.sum(es, axis=-1, keepdims=True)
            zt = jnp.sum(et, axis=-1, keepdims=True)
            zprod = zs * zt
            s = jnp.sum(jnp.sqrt(es * et + eps * zprod), axis=-1, keepdims=True)
        bc = s * lax.rsqrt(zprod)                                  # (bR, 1)
    else:
        # Keep abs + eps-inside-sqrt semantics exactly as in the PyTorch module.
        bc = jnp.sum(jnp.sqrt(jnp.abs(fs * ft) + eps), axis=-1, keepdims=True)

    loss = -jnp.log(jnp.maximum(bc, eps))                          # (bR, 1)
    loss = _apply_row_mask(loss, pl.program_id(0) * block_rows, rows, block_rows)
    partial = jnp.sum(loss)
    # Lane-dense store: fill the (1, 8, 128) block (wrapper reads [i, 0, 0]).
    out_ref[...] = jnp.broadcast_to(partial, out_ref.shape).astype(jnp.float32)


# --------------------------------------------------------------------------
# Kernel 2: N-tiled streaming kernel (when a full row does not fit VMEM).
# Softmax: two phases — (0) online max/Z, (1) accumulate sqrt(e_s*e_t+eps*Z).
# --------------------------------------------------------------------------
def _bhat_ntiled_kernel(fs_ref, ft_ref, out_ref,
                        m_s, m_t, z_s, z_t, s_acc, *,
                        eps, use_softmax, rows, n, block_rows, block_cols):
    i = pl.program_id(0)
    if use_softmax:
        ph = pl.program_id(1)
        k = pl.program_id(2)
        nk = pl.num_programs(2)
    else:
        k = pl.program_id(1)
        nk = pl.num_programs(1)

    fs = fs_ref[...].astype(jnp.float32)   # (bR, bC)
    ft = ft_ref[...].astype(jnp.float32)

    mask_cols = (n % block_cols) != 0
    if mask_cols:
        col_ids = k * block_cols + lax.broadcasted_iota(
            jnp.int32, (fs.shape[0], fs.shape[1]), 1)
        col_mask = col_ids < n

    def final_partial(bc):
        loss = -jnp.log(jnp.maximum(bc, eps))
        loss = _apply_row_mask(loss, i * block_rows, rows, block_rows)
        return jnp.sum(loss)

    if use_softmax:
        @pl.when((ph == 0) & (k == 0))
        def _():
            m_s[...] = jnp.full_like(m_s, -jnp.inf)
            m_t[...] = jnp.full_like(m_t, -jnp.inf)
            z_s[...] = jnp.zeros_like(z_s)
            z_t[...] = jnp.zeros_like(z_t)

        @pl.when(ph == 0)
        def _():
            fs_m = jnp.where(col_mask, fs, -jnp.inf) if mask_cols else fs
            ft_m = jnp.where(col_mask, ft, -jnp.inf) if mask_cols else ft
            ms_new = jnp.maximum(m_s[...], jnp.max(fs_m, axis=-1, keepdims=True))
            mt_new = jnp.maximum(m_t[...], jnp.max(ft_m, axis=-1, keepdims=True))
            z_s[...] = (z_s[...] * jnp.exp(m_s[...] - ms_new)
                        + jnp.sum(jnp.exp(fs_m - ms_new), axis=-1, keepdims=True))
            z_t[...] = (z_t[...] * jnp.exp(m_t[...] - mt_new)
                        + jnp.sum(jnp.exp(ft_m - mt_new), axis=-1, keepdims=True))
            m_s[...] = ms_new
            m_t[...] = mt_new

        @pl.when((ph == 1) & (k == 0))
        def _():
            s_acc[...] = jnp.zeros_like(s_acc)

        @pl.when(ph == 1)
        def _():
            zprod = z_s[...] * z_t[...]
            term = jnp.sqrt(jnp.exp(fs - m_s[...]) * jnp.exp(ft - m_t[...])
                            + eps * zprod)
            if mask_cols:
                term = jnp.where(col_mask, term, 0.0)
            s_acc[...] = s_acc[...] + jnp.sum(term, axis=-1, keepdims=True)

        @pl.when((ph == 1) & (k == nk - 1))
        def _():
            zprod = z_s[...] * z_t[...]
            bc = s_acc[...] * lax.rsqrt(zprod)
            out_ref[...] = jnp.broadcast_to(
                final_partial(bc), out_ref.shape).astype(jnp.float32)
    else:
        @pl.when(k == 0)
        def _():
            s_acc[...] = jnp.zeros_like(s_acc)

        term = jnp.sqrt(jnp.abs(fs * ft) + eps)
        if mask_cols:
            term = jnp.where(col_mask, term, 0.0)
        s_acc[...] = s_acc[...] + jnp.sum(term, axis=-1, keepdims=True)

        @pl.when(k == nk - 1)
        def _():
            out_ref[...] = jnp.broadcast_to(
                final_partial(s_acc[...]), out_ref.shape).astype(jnp.float32)


# --------------------------------------------------------------------------
# Wrapper
# --------------------------------------------------------------------------
def bhattacharyya_loss(f_s, f_t, *, eps=1e-12, use_softmax=True,
                       block_rows=None, block_cols=None,
                       low_precision_transcendentals=False):
    """JAX wrapper reproducing BhattacharyyaLoss.forward for 4-D (NCHW) or 3-D inputs."""
    assert f_s.shape == f_t.shape, (f_s.shape, f_t.shape)
    if f_s.ndim == 4:
        b, c, h, w = f_s.shape
        f_s = f_s.reshape(b, c, h * w)
        f_t = f_t.reshape(b, c, h * w)
    b, c, n = f_s.shape
    rows = b * c
    fs2 = f_s.reshape(rows, n)
    ft2 = f_t.reshape(rows, n)

    itemsize = max(jnp.dtype(fs2.dtype).itemsize, jnp.dtype(ft2.dtype).itemsize)
    vmem_cap = _vmem_capacity_bytes()
    vmem_limit = int(min(vmem_cap // 2, 64 * 1024 * 1024))  # 32 MiB v7x, 64 MiB v5e/v6e
    budget = (vmem_limit * 3) // 4                          # headroom for regalloc/padding

    # Per-element footprint: 2 inputs x 2 pipeline buffers + in-kernel f32
    # working set (casts, exp results, product) for the softmax path.
    k_tmp = 6 if use_softmax else 3

    def bytes_per_row(cols):
        return cols * (2 * 2 * itemsize + k_tmp * 4)

    # Decide whether the N (=H*W) axis must be tiled: the minimum (8-row)
    # full-N tile has to fit the budget; otherwise stream N (online softmax).
    n_tiling = block_cols is not None
    if not n_tiling and bytes_per_row(n) * min(rows, _SUBLANE) > budget:
        n_tiling = True

    if n_tiling:
        if block_cols is None:
            cap_cols = budget // (min(rows, _SUBLANE) * (2 * 2 * itemsize + k_tmp * 4))
            block_cols = max(_LANE, (cap_cols // _LANE) * _LANE)
        block_cols = min(int(block_cols), _cdiv(n, _LANE) * _LANE)
        assert block_cols % _LANE == 0, block_cols
        tile_cols = block_cols
    else:
        tile_cols = n

    if block_rows is None:
        block_rows = _pick_block_rows(rows, bytes_per_row(tile_cols), budget)
    else:
        block_rows = min(int(block_rows), rows)
        if block_rows < rows:
            block_rows = max(_SUBLANE, (block_rows // _SUBLANE) * _SUBLANE)
    num_row_tiles = _cdiv(rows, block_rows)

    # Lane-dense (and sublane-full) per-tile partial-sum blocks.
    out_shape = jax.ShapeDtypeStruct((num_row_tiles, _SUBLANE, _LANE), jnp.float32)
    out_block = (1, _SUBLANE, _LANE)

    # Extra buffering only pays when per-step DMA latency is exposed (small tiles).
    small_tile = block_rows * tile_cols * itemsize < (512 * 1024)

    if not n_tiling:
        kernel = functools.partial(
            _bhat_fulln_kernel, eps=float(eps), use_softmax=use_softmax,
            rows=rows, block_rows=block_rows,
            low_precision_transcendentals=low_precision_transcendentals)
        grid = (num_row_tiles,)
        buffered = small_tile and num_row_tiles > 1
        in_specs = [_in_spec((block_rows, n), lambda i: (i, 0), buffered),
                    _in_spec((block_rows, n), lambda i: (i, 0), buffered)]
        out_specs = pl.BlockSpec(out_block, lambda i: (i, 0, 0))
        scratch_shapes = []
        dims = ("parallel",)
    else:
        # TODO(synk): low_precision_transcendentals is not plumbed into the
        # N-tiled path yet; it always computes exp/sqrt in f32.
        kernel = functools.partial(
            _bhat_ntiled_kernel, eps=float(eps), use_softmax=use_softmax,
            rows=rows, n=n, block_rows=block_rows, block_cols=block_cols)
        num_n_tiles = _cdiv(n, block_cols)
        buffered = small_tile and num_n_tiles > 1
        if use_softmax:
            grid = (num_row_tiles, 2, num_n_tiles)   # (row tile, phase, N tile)
            in_map = lambda i, ph, k: (i, k)
            out_map = lambda i, ph, k: (i, 0, 0)
            dims = ("parallel", "arbitrary", "arbitrary")
        else:
            grid = (num_row_tiles, num_n_tiles)
            in_map = lambda i, k: (i, k)
            out_map = lambda i, k: (i, 0, 0)
            dims = ("parallel", "arbitrary")
        in_specs = [_in_spec((block_rows, block_cols), in_map, buffered),
                    _in_spec((block_rows, block_cols), in_map, buffered)]
        out_specs = pl.BlockSpec(out_block, out_map)
        scratch_shapes = [pltpu.VMEM((block_rows, 1), jnp.float32)] * 5

    partials = pl.pallas_call(
        kernel,
        out_shape=out_shape,
        grid_spec=pltpu.PrefetchScalarGridSpec(
            num_scalar_prefetch=0,
            grid=grid,
            in_specs=in_specs,
            out_specs=out_specs,
            scratch_shapes=scratch_shapes,
        ),
        compiler_params=pltpu.CompilerParams(
            dimension_semantics=dims,
            vmem_limit_bytes=vmem_limit,
        ),
    )(fs2, ft2)

    # Final reduction (mean over all B*C rows) in the wrapper.
    return jnp.sum(partials[:, 0, 0]) / jnp.float32(rows)


def _reference_loss(f_s, f_t, eps=1e-12, use_softmax=True):
    """Pure-JAX reference mirroring the PyTorch module."""
    f_s = f_s.astype(jnp.float32)
    f_t = f_t.astype(jnp.float32)
    if f_s.ndim == 4:
        b, c, h, w = f_s.shape
        f_s = f_s.reshape(b, c, h * w)
        f_t = f_t.reshape(b, c, h * w)
    if use_softmax:
        f_s = jax.nn.softmax(f_s, axis=-1)
        f_t = jax.nn.softmax(f_t, axis=-1)
    bc = jnp.sum(jnp.sqrt(jnp.abs(f_s * f_t) + eps), axis=-1)
    loss = -jnp.log(jnp.maximum(bc, eps))   # == torch.clamp(bc, min=eps)
    return loss.mean()


if __name__ == "__main__":
    key = jax.random.PRNGKey(0)
    ks, kt = jax.random.split(key)

    def check(name, out, ref, rtol, atol):
        out = jax.block_until_ready(out)
        ref = jax.block_until_ready(ref)
        assert jnp.allclose(out, ref, rtol=rtol, atol=atol), (name, out, ref)

    # 1) Small NCHW feature maps, softmax path (full-N kernel).
    f_s = jax.random.normal(ks, (2, 4, 16, 16), dtype=jnp.float32)
    f_t = jax.random.normal(kt, (2, 4, 16, 16), dtype=jnp.float32)
    check("softmax", bhattacharyya_loss(f_s, f_t), _reference_loss(f_s, f_t),
          1e-5, 1e-6)

    # 2) use_softmax=False path (abs + eps-inside-sqrt semantics kept verbatim).
    check("no-softmax", bhattacharyya_loss(f_s, f_t, use_softmax=False),
          _reference_loss(f_s, f_t, use_softmax=False), 1e-5, 1e-6)

    # 3) Non-multiple-of-128 spatial size (14x14 = 196 lanes), full-N kernel.
    g_s = jax.random.normal(ks, (2, 4, 14, 14), dtype=jnp.float32)
    g_t = jax.random.normal(kt, (2, 4, 14, 14), dtype=jnp.float32)
    check("lanes-196", bhattacharyya_loss(g_s, g_t), _reference_loss(g_s, g_t),
          1e-5, 1e-6)

    # 4) rows (B*C) not divisible by block_rows -> cdiv grid + row masking.
    h_s = jax.random.normal(ks, (2, 12, 16, 16), dtype=jnp.float32)
    h_t = jax.random.normal(kt, (2, 12, 16, 16), dtype=jnp.float32)
    check("row-mask", bhattacharyya_loss(h_s, h_t, block_rows=16),
          _reference_loss(h_s, h_t), 1e-5, 1e-6)

    # 5) Forced N tiling (online-softmax streaming path), softmax.
    check("ntile-softmax", bhattacharyya_loss(f_s, f_t, block_cols=128),
          _reference_loss(f_s, f_t), 1e-5, 1e-6)

    # 6) Forced N tiling, non-softmax.
    check("ntile-no-softmax",
          bhattacharyya_loss(f_s, f_t, use_softmax=False, block_cols=128),
          _reference_loss(f_s, f_t, use_softmax=False), 1e-5, 1e-6)

    # 7) Forced N tiling with partial last N tile (196 lanes) -> lane masking.
    check("ntile-lane-mask", bhattacharyya_loss(g_s, g_t, block_cols=128),
          _reference_loss(g_s, g_t), 1e-5, 1e-6)

    # 8) N tiling + row masking together.
    check("ntile-row-mask",
          bhattacharyya_loss(h_s, h_t, block_rows=16, block_cols=128),
          _reference_loss(h_s, h_t), 1e-5, 1e-6)

    # 9) bf16 inputs (half the HBM bytes); loose tolerance vs f32 reference.
    check("bf16-inputs",
          bhattacharyya_loss(f_s.astype(jnp.bfloat16), f_t.astype(jnp.bfloat16)),
          _reference_loss(f_s, f_t), 2e-2, 1e-3)

    # 10) bf16 exp/sqrt (EUP relief on v6e/v7x); loose tolerance.
    check("bf16-eup",
          bhattacharyya_loss(f_s, f_t, low_precision_transcendentals=True),
          _reference_loss(f_s, f_t), 2e-2, 2e-3)

    print("KERNEL_OK")
</pallas_src>

<mosaic_0001>
module attributes {stable_mosaic.version = 11 : i64} {
  func.func @_bhat_fulln_kernel(%arg0: i32, %arg1: memref<8x256xf32, #tpu.memory_space<vmem>>, %arg2: memref<8x256xf32, #tpu.memory_space<vmem>>, %arg3: memref<1x8x128xf32, #tpu.memory_space<vmem>>) attributes {dimension_semantics = [#tpu.dimension_semantics<parallel>], iteration_bounds = array<i64: 1>, scalar_prefetch = 0 : i64, scratch_operands = 0 : i64, tpu.core_type = #tpu.core_type<tc>, window_params = [{transform_indices = @transform_0, window_bounds = array<i64: 8, 256>}, {transform_indices = @transform_1, window_bounds = array<i64: 8, 256>}, {transform_indices = @transform_2, window_bounds = array<i64: 1, 8, 128>}]} {
    %c0 = arith.constant 0 : index
    %c0_0 = arith.constant 0 : index
    %0 = vector.load %arg1[%c0, %c0_0] : memref<8x256xf32, #tpu.memory_space<vmem>>, vector<8x256xf32>
    %c0_1 = arith.constant 0 : index
    %c0_2 = arith.constant 0 : index
    %1 = vector.load %arg2[%c0_1, %c0_2] : memref<8x256xf32, #tpu.memory_space<vmem>>, vector<8x256xf32>
    %cst = arith.constant dense<0xFF800000> : vector<8xf32>
    %2 = vector.multi_reduction <maximumf>, %0, %cst [1] : vector<8x256xf32> to vector<8xf32>
    %3 = vector.shape_cast %2 : vector<8xf32> to vector<8x1xf32>
    %4 = vector.broadcast %3 : vector<8x1xf32> to vector<8x256xf32>
    %5 = arith.subf %0, %4 : vector<8x256xf32>
    %cst_3 = arith.constant dense<0xFF800000> : vector<8xf32>
    %6 = vector.multi_reduction <maximumf>, %1, %cst_3 [1] : vector<8x256xf32> to vector<8xf32>
    %7 = vector.shape_cast %6 : vector<8xf32> to vector<8x1xf32>
    %8 = vector.broadcast %7 : vector<8x1xf32> to vector<8x256xf32>
    %9 = arith.subf %1, %8 : vector<8x256xf32>
    %10 = math.exp %5 : vector<8x256xf32>
    %11 = math.exp %9 : vector<8x256xf32>
    %cst_4 = arith.constant dense<0.000000e+00> : vector<8xf32>
    %12 = vector.multi_reduction <add>, %10, %cst_4 [1] : vector<8x256xf32> to vector<8xf32>
    %13 = vector.shape_cast %12 : vector<8xf32> to vector<8x1xf32>
    %cst_5 = arith.constant dense<0.000000e+00> : vector<8xf32>
    %14 = vector.multi_reduction <add>, %11, %cst_5 [1] : vector<8x256xf32> to vector<8xf32>
    %15 = vector.shape_cast %14 : vector<8xf32> to vector<8x1xf32>
    %16 = arith.mulf %13, %15 : vector<8x1xf32>
    %17 = arith.mulf %10, %11 : vector<8x256xf32>
    %cst_6 = arith.constant 9.99999996E-13 : f32
    %18 = vector.broadcast %cst_6 : f32 to vector<8x1xf32>
    %19 = arith.mulf %18, %16 : vector<8x1xf32>
    %20 = vector.broadcast %19 : vector<8x1xf32> to vector<8x256xf32>
    %21 = arith.addf %17, %20 : vector<8x256xf32>
    %22 = math.sqrt %21 : vector<8x256xf32>
    %cst_7 = arith.constant dense<0.000000e+00> : vector<8xf32>
    %23 = vector.multi_reduction <add>, %22, %cst_7 [1] : vector<8x256xf32> to vector<8xf32>
    %24 = vector.shape_cast %23 : vector<8xf32> to vector<8x1xf32>
    %25 = math.rsqrt %16 : vector<8x1xf32>
    %26 = arith.mulf %24, %25 : vector<8x1xf32>
    %cst_8 = arith.constant 9.99999996E-13 : f32
    %27 = vector.broadcast %cst_8 : f32 to vector<8x1xf32>
    %28 = arith.maximumf %26, %27 : vector<8x1xf32>
    %29 = math.log %28 : vector<8x1xf32>
    %cst_9 = arith.constant 0.000000e+00 : f32
    %30 = vector.broadcast %cst_9 : f32 to vector<8x1xf32>
    %31 = arith.subf %30, %29 : vector<8x1xf32>
    %32 = vector.shape_cast %31 : vector<8x1xf32> to vector<1x8x1xf32>
    %cst_10 = arith.constant dense<0.000000e+00> : vector<1xf32>
    %33 = vector.multi_reduction <add>, %32, %cst_10 [1, 2] : vector<1x8x1xf32> to vector<1xf32>
    %34 = vector.shape_cast %33 : vector<1xf32> to vector<1x1x1xf32>
    %35 = vector.extract %34[0, 0, 0] : f32 from vector<1x1x1xf32>
    %36 = vector.broadcast %35 : f32 to vector<1x8x128xf32>
    %c0_11 = arith.constant 0 : index
    %c0_12 = arith.constant 0 : index
    %c0_13 = arith.constant 0 : index
    %37 = vector.load %arg3[%c0_11, %c0_12, %c0_13] : memref<1x8x128xf32, #tpu.memory_space<vmem>>, vector<1x8x128xf32>
    tpu.vector_store %arg3[%c0_11, %c0_12, %c0_13], %36 {strides = array<i32>} : memref<1x8x128xf32, #tpu.memory_space<vmem>>, vector<1x8x128xf32>,
    return
  }
  func.func @transform_0(%arg0: i32) -> (i32, i32) {
    %c0_i32 = arith.constant 0 : i32
    %c0_i32_0 = arith.constant 0 : i32
    return %arg0, %c0_i32 : i32, i32
  }
  func.func @transform_1(%arg0: i32) -> (i32, i32) {
    %c0_i32 = arith.constant 0 : i32
    %c0_i32_0 = arith.constant 0 : i32
    return %arg0, %c0_i32 : i32, i32
  }
  func.func @transform_2(%arg0: i32) -> (i32, i32, i32) {
    %c0_i32 = arith.constant 0 : i32
    %c0_i32_0 = arith.constant 0 : i32
    %c0_i32_1 = arith.constant 0 : i32
    return %arg0, %c0_i32, %c0_i32_0 : i32, i32, i32
  }
}

</mosaic_0001>

<bundles_post_ra>
// kernel: tpu_custom_call.1
= control target key start
LH: loop header
LB: loop body
LE: loop exit
PB: predicated region body
PF: predicated region fallthrough
CT: control target
= control target key end

     0   :  { %7 = vsyncpa [#allocation3], 0  ;;  %s269_s0 = inlined_call_operand.hbm [shape: f32[8,256], index: 0, kind: input, shape index: {}]   ;;  %s270_s1 = inlined_call_operand.hbm [shape: f32[8,256], index: 1, kind: input, shape index: {}]   ;;  %s271_s2 = inlined_call_operand.hbm [shape: f32[1,8,128], index: 2, kind: output, shape index: {}]  }
   0x1   :  { %8 = vsyncpa [#allocation6], 0 }
   0x2   :  { %9 = vsyncpa [#allocation4], 0  ;;  %s215_s9 = smov [#allocation2]   ;;  %s216_s11 = smov [#allocation5]  }
   0x3   :  { %s16_s10 = sshll.u32 %s215_s9, 4  ;;  %s26_s12 = sshll.u32 %s216_s11, 4  ;;  %s17_s10 = int_to_ptr.vmem [resolvable:$true] %s16_s10  ;;  %s27_s12 = int_to_ptr.vmem [resolvable:$true] %s26_s12 }
   0x4   :  { %s143_s15 = scalar_lea.hbm %s269_s0, 256 }
   0x5   :  { %p144_p0 = scmp.ne.s32.totalorder %s269_s0, %s143_s15  ;;  %p147_p1 = scmp.lt.u32.totalorder %s143_s15, %s269_s0 }
   0x7   :  { %p149_p2 = pnand %p147_p1, %p144_p0 }
   0x9   :  { %152 = shalt.err (!%p149_p2)
}
   0xa   :  { %s153_s20 = scalar_lea.vmem %s17_s10, 256  ;;  %p158_p4 = scmp.lt.s32.totalorder %s17_s10, %s17_s10 }
   0xb   :  { %p154_p3 = scmp.ne.s32.totalorder %s17_s10, %s153_s20  ;;  %p159_p5 = scmp.lt.s32.totalorder %s153_s20, %s153_s20 }
   0xd   :  { %p160_p6 = por %p159_p5, %p158_p4 }
   0xf   :  { %p161_p7 = pnand %p160_p6, %p154_p3 }
  0x11   :  { %164 = shalt.err (!%p161_p7)
}
  0x12   :  { %19 = dma.hbm_to_vmem [thread:$0]  %s269_s0, 256, %s17_s10, [#allocation3]  }
  0x13   :  { %s165_s25 = scalar_lea.hbm %s270_s1, 256 }
  0x14   :  { %p166_p8 = scmp.ne.s32.totalorder %s270_s1, %s165_s25  ;;  %p169_p9 = scmp.lt.u32.totalorder %s165_s25, %s270_s1 }
  0x16   :  { %p171_p10 = pnand %p169_p9, %p166_p8 }
  0x18   :  { %174 = shalt.err (!%p171_p10)
}
  0x19   :  { %s175_s30 = scalar_lea.vmem %s27_s12, 256  ;;  %p180_p12 = scmp.lt.s32.totalorder %s27_s12, %s27_s12 }
  0x1a   :  { %p176_p11 = scmp.ne.s32.totalorder %s27_s12, %s175_s30  ;;  %p181_p13 = scmp.lt.s32.totalorder %s175_s30, %s175_s30 }
  0x1c   :  { %p182_p0 = por %p181_p13, %p180_p12 }
  0x1e   :  { %p183_p1 = pnand %p182_p0, %p176_p11 }
  0x20   :  { %186 = shalt.err (!%p183_p1)
}
  0x21   :  { %29 = dma.hbm_to_vmem [thread:$0]  %s270_s1, 256, %s27_s12, [#allocation6]  }
  0x22   :  { %209 = dma.done.wait [#allocation3], 256  }
  0x23   :  { %210 = vsyncadd [#allocation3], 4294967040 }
  0x24   :  { %211 = dma.done.wait [#allocation6], 256  }
  0x25   :  { %212 = vsyncadd [#allocation6], 4294967040  ;;  %v36_v0 = vld [vmem:[#allocation2] sm:$0xff]  ;;  %v37_v1 = vld [vmem:[#allocation2 + $0x8] sm:$0xff]  ;;  %vm93_vm4 = vcmask 7168   ;;  %s217_s1 = smov [#allocation7]  }
  0x26   :  { %v38_v2 = vld [vmem:[#allocation5] sm:$0xff]  ;;  %v40_v3 = vmax.f32 %v36_v0, %v37_v1  ;;  %v39_v4 = vld [vmem:[#allocation5 + $0x8] sm:$0xff]  ;;  %s112_s4 = sshll.u32 %s217_s1, 4  ;;  %s113_s4 = int_to_ptr.vmem [resolvable:$true] %s112_s4 }
  0x27   :  { %v45_v5 = vmax.f32 %v38_v2, %v39_v4  ;;  %s187_s6 = scalar_lea.vmem %s113_s4, 128  ;;  %p192_p3 = scmp.lt.s32.totalorder %s113_s4, %s113_s4 }
  0x28   :  { %41 = vmax.xlane.f32.xlu0 %v40_v3  ;;  %p188_p2 = scmp.ne.s32.totalorder %s113_s4, %s187_s6  ;;  %p193_p4 = scmp.lt.s32.totalorder %s187_s6, %s187_s6 }
  0x2a   :  { %p194_p5 = por %p193_p4, %p192_p3 }
  0x2c   :  { %46 = vmax.xlane.f32.xlu0 %v45_v5  ;;  %p195_p6 = pnand %p194_p5, %p188_p2 }
  0xb5   :  { %v42_v6 = vpop.xlane.xlu0 %41 }
  0xb6   :  { %v43_v7 = vsub.f32 %v36_v0, %v42_v6  ;;  %v44_v8 = vsub.f32 %v37_v1, %v42_v6 }
  0xb8   :  { %v50_v9 = vmul.f32 1.442695, %v43_v7  ;;  %v52_v10 = vmul.f32 1.442695, %v44_v8 }
  0xb9   :  { %v47_v11 = vpop.xlane.xlu0 %46 }
  0xba   :  { %127 = vpow2.f32 %v50_v9  ;;  %v48_v12 = vsub.f32 %v38_v2, %v47_v11  ;;  %v49_v13 = vsub.f32 %v39_v4, %v47_v11 }
  0xbb   :  { %129 = vpow2.f32 %v52_v10 }
  0xbc   :  { %v54_v14 = vmul.f32 1.442695, %v48_v12  ;;  %v56_v15 = vmul.f32 1.442695, %v49_v13 }
  0xbe   :  { %131 = vpow2.f32 %v54_v14 }
  0xbf   :  { %133 = vpow2.f32 %v56_v15 }
  0xc4   :  { %v128_v16 = vpop.eup %127 }
  0xc5   :  { %v130_v17 = vpop.eup %129 }
  0xc6   :  { %v58_v18 = vadd.f32 %v130_v17, %v128_v16 }
  0xc8   :  { %v132_v19 = vpop.eup %131  ;;  %59 = vadd.xlane.f32.xlu1 %v58_v18 }
  0xc9   :  { %v134_v20 = vpop.eup %133  ;;  %v65_v21 = vmul.f32 %v132_v19, %v128_v16 }
  0xca   :  { %v61_v22 = vadd.f32 %v134_v20, %v132_v19  ;;  %v66_v23 = vmul.f32 %v134_v20, %v130_v17 }
  0xcc   :  { %62 = vadd.xlane.f32.xlu1 %v61_v22 }
 0x155   :  { %v60_v24 = vpop.xlane.xlu1 %59 }
 0x159   :  { %v63_v25 = vpop.xlane.xlu1 %62 }
 0x15a   :  { %v64_v26 = vmul.f32 %v63_v25, %v60_v24 }
 0x15c   :  { %v67_v27 = vmul.f32 1e-12, %v64_v26 }
 0x15e   :  { %v68_v28 = vadd.f32 %v67_v27, %v65_v21  ;;  %v69_v29 = vadd.f32 %v67_v27, %v66_v23 }
 0x160   :  { %135 = vrsqrt.f32 %v68_v28  ;;  %vm72_vm0 = vcmp.eq.f32.partialorder %v68_v28, inf  ;;  %v75_v33 = vand.u32 2147483648, %v68_v28  ;;  %vm74_vm1 = vcmp.eq.f32.partialorder %v68_v28, 0.0 }
 0x161   :  { %137 = vrsqrt.f32 %v69_v29  ;;  %vm79_vm2 = vcmp.eq.f32.partialorder %v69_v29, inf  ;;  %v82_v36 = vand.u32 2147483648, %v69_v29  ;;  %vm81_vm3 = vcmp.eq.f32.partialorder %v69_v29, 0.0 }
 0x162   :  { %139 = vrsqrt.f32 %v64_v26 }
 0x16a   :  { %v136_v30 = vpop.eup %135 }
 0x16b   :  { %v138_v31 = vpop.eup %137  ;;  %v71_v32 = vmul.f32 %v136_v30, %v68_v28 }
 0x16c   :  { %v78_v34 = vmul.f32 %v138_v31, %v69_v29  ;;  %v140_v41 = vpop.eup %139 }
 0x16d   :  { %v73_v35 = vsel %vm72_vm0, %v68_v28, %v71_v32 }
 0x16e   :  { %v76_v37 = vsel %vm74_vm1, %v75_v33, %v73_v35  ;;  %v80_v38 = vsel %vm79_vm2, %v69_v29, %v78_v34 }
 0x16f   :  { %v83_v39 = vsel %vm81_vm3, %v82_v36, %v80_v38 }
 0x170   :  { %v84_v40 = vadd.f32 %v83_v39, %v76_v37 }
 0x172   :  { %85 = vadd.xlane.f32.xlu0 %v84_v40 }
 0x1ff   :  { %v86_v42 = vpop.xlane.xlu0 %85 }
 0x200   :  { %v88_v43 = vmul.f32 %v140_v41, %v86_v42 }
 0x202   :  { %v89_v44 = vmax.f32 %v88_v43, 1e-12 }
 0x204   :  { %141 = vlog2.f32 %v89_v44 }
 0x20e   :  { %v142_v45 = vpop.eup %141 }
 0x20f   :  { %v91_v46 = vmul.f32 0.6931472, %v142_v45 }
 0x211   :  { %v92_v47 = vsub.f32 0.0, %v91_v46 }
 0x213   :  { %v94_v48 = vsel %vm93_vm4, %v92_v47, 0.0 }
 0x214   :  { %95 = vadd.xlane.f32.xlu1 %v94_v48 }
 0x2a1   :  { %v96_v49 = vpop.xlane.xlu1 %95 }
 0x2a2   :  { %v97_v50 = vrot.slane %v96_v49, 4 }
 0x2a4   :  { %v98_v51 = vadd.f32 %v97_v50, %v96_v49 }
 0x2a6   :  { %v99_v52 = vrot.slane %v98_v51, 2 }
 0x2a8   :  { %v100_v53 = vadd.f32 %v99_v52, %v98_v51 }
 0x2aa   :  { %v101_v54 = vrot.slane %v100_v53, 1 }
 0x2ac   :  { %v102_v55 = vadd.f32 %v101_v54, %v100_v53 }
 0x2ae   :  { %122 = vpush %v102_v55 }
 0x2df   :  { %s123_s5 = spop %122 }
 0x2e0   :  { %v104_v56 = vstv %s123_s5 }
 0x2e1   :  { %105 = vst [vmem:[#allocation7] sm:$0xff] %v104_v56 }
 0x2e2   :  { %198 = shalt.err (!%p195_p6)
}
 0x2e3   :  { %s199_s9 = scalar_lea.hbm %s271_s2, 128 }
 0x2e4   :  { %p200_p7 = scmp.ne.s32.totalorder %s271_s2, %s199_s9  ;;  %p203_p8 = scmp.lt.u32.totalorder %s199_s9, %s271_s2 }
 0x2e6   :  { %p205_p9 = pnand %p203_p8, %p200_p7 }
 0x2e8   :  { %208 = shalt.err (!%p205_p9)
}
 0x2e9   :  { %115 = dma.vmem_to_hbm [thread:$0]  %s113_s4, 128, %s271_s2, [#allocation4]  }
 0x2ea   :  { %213 = dma.done.wait [#allocation4], 128  }
 0x2eb   :  { %214 = vsyncadd [#allocation4], 4294967168 }
 0x2ec   :  { %119 = vsyncpa [#allocation3], 1 }
 0x2ed   :  { %120 = vsyncpa [#allocation6], 1 }
 0x2ee   :  { %121 = vsyncpa [#allocation4], 1 }

</bundles_post_ra>
